<compile_context>
chip_gen: v6e
topology: v6e:2x2x1
jax: 0.10.0
libtpu: 0.0.40
codegen_flags: <defaults>
</compile_context>

<pallas_src>
import functools

import jax
import jax.numpy as jnp
from jax.experimental import pallas as pl
from jax.experimental.pallas import tpu as pltpu


def _round_up(x, m):
    return ((x + m - 1) // m) * m


def _pick_block_batch(n, hw, target_rows=512):
    """Images per grid step: pack small images so M = nb*hw approaches the MXU tile height,
    but keep >= 2 grid steps when n >= 2 so both v7x TensorCores get work."""
    nb = 1
    for cand in range(1, n + 1):
        if n % cand:
            continue
        if cand * hw > target_rows:
            break
        if n >= 2 and n // cand < 2:
            break
        nb = cand
    return nb


def _conv_bn_relu_kernel(x_ref, w_ref, s_ref, b_ref, o_ref, *, kh):
    # x_ref: (Nb, Hp, W, Kw)      bf16 -- width-unfolded, row-padded NHWC input
    # w_ref: (kh, Kw, Cout_pad)   bf16 -- weight with (kw, Cin) folded into Kw
    # s_ref: (1, Cout_pad)        f32  -- BN scale (gamma / sqrt(var + eps))
    # b_ref: (1, Cout_pad)        f32  -- folded conv + BN bias
    # o_ref: (Nb, H*W, Cout_pad)  f32
    nb, hp, w, kw_cin = x_ref.shape
    h = hp - (kh - 1)
    cout_pad = o_ref.shape[-1]
    m = nb * h * w

    # kh matmuls with K = kw*Cin_pad, value-level accumulation (registers / MRB), one
    # fused epilogue + store.  The row slices are contiguous along a major dim -- the
    # kw column taps were folded onto the lane axis by the wrapper unfold, so no
    # per-tap sublane/lane shuffles happen in the hot path.
    acc = None
    for di in range(kh):                       # static unroll over the kh row taps
        slab = x_ref[:, di:di + h, :, :].reshape(m, kw_cin)
        d = jnp.dot(slab, w_ref[di], preferred_element_type=jnp.float32)
        acc = d if acc is None else acc + d
    y = acc * s_ref[...] + b_ref[...]          # f32 BatchNorm epilogue
    o_ref[...] = jnp.maximum(y, 0.0).reshape(nb, h * w, cout_pad).astype(o_ref.dtype)


def conv_block_forward(x, params):
    """x: (N, Cin, H, W) float32.  Returns (N, Cout, H, W) float32."""
    w = params["conv_weight"]        # (Cout, Cin, kh, kw)
    cb = params["conv_bias"]         # (Cout,)
    gamma = params["bn_gamma"]       # (Cout,)
    beta = params["bn_beta"]         # (Cout,)
    rmean = params["bn_running_mean"]
    rvar = params["bn_running_var"]
    eps = params["bn_eps"]

    N, Cin, H, W = x.shape
    Cout, _, kh, kw = w.shape
    assert kh % 2 == 1 and kw % 2 == 1, "'same' padding path requires odd kernel sizes"
    ph, pw = kh // 2, kw // 2
    Hp = H + 2 * ph

    Cin_pad = _round_up(Cin, 8)       # K-restructure makes 16-alignment moot; 8 keeps the
    Cout_pad = _round_up(Cout, 128)   # unfolded input small.  Lane-dense output channels.
    Kw = kw * Cin_pad                 # contraction depth of each row-tap matmul

    # ---- eval-mode BatchNorm as per-channel f32 scale/bias (applied in-kernel) ----
    scale = gamma / jnp.sqrt(rvar + eps)                        # (Cout,)
    bias = (cb - rmean) * scale + beta                          # (Cout,)
    scale2d = jnp.pad(scale, (0, Cout_pad - Cout)).reshape(1, Cout_pad).astype(jnp.float32)
    bias2d = jnp.pad(bias, (0, Cout_pad - Cout)).reshape(1, Cout_pad).astype(jnp.float32)

    # ---- weight: (Cout,Cin,kh,kw) -> (kh, kw*Cin_pad, Cout_pad), bf16 ----
    w_t = w.transpose(2, 3, 1, 0)                               # (kh, kw, Cin, Cout)
    w_t = jnp.pad(w_t, ((0, 0), (0, 0), (0, Cin_pad - Cin), (0, Cout_pad - Cout)))
    w_unf = w_t.reshape(kh, Kw, Cout_pad).astype(jnp.bfloat16)

    # ---- input: NCHW -> NHWC, zero-pad spatial + channel, bf16, width-unfold ----
    # x_unf[n, i, j, dj*Cin_pad + c] = x_padded[n, i, j + dj, c]; the kw column taps live on
    # the lane axis, so the kernel never performs a width shift.
    # TODO(synk): for large Cin the kw-fold of HBM bytes could be avoided by moving the
    #             unfold (and the spatial padding) inside the kernel.
    x_nhwc = x.transpose(0, 2, 3, 1)
    x_p = jnp.pad(x_nhwc, ((0, 0), (ph, ph), (pw, pw), (0, Cin_pad - Cin)))
    x_p = x_p.astype(jnp.bfloat16)
    x_unf = jnp.concatenate([x_p[:, :, dj:dj + W, :] for dj in range(kw)], axis=-1)
    # x_unf: (N, Hp, W, Kw)

    Nb = _pick_block_batch(N, H * W)
    grid = (N // Nb,)

    kernel = functools.partial(_conv_bn_relu_kernel, kh=kh)

    # VMEM budget: double-buffered blocks + f32 accumulator headroom, clamped to 48 MiB
    # (safe under v7x's 64 MiB/TC; raise toward ~96 MiB on v5e/v6e for very large images).
    x_blk = Nb * Hp * W * Kw * 2
    w_blk = kh * Kw * Cout_pad * 2
    sb_blk = 2 * Cout_pad * 4
    o_blk = Nb * H * W * Cout_pad * 4
    vmem_needed = 2 * (x_blk + w_blk + sb_blk + o_blk) + o_blk
    vmem_limit = int(min(max(vmem_needed + (4 << 20), 16 << 20), 48 << 20))

    flops = 2 * N * H * W * kh * Kw * Cout_pad
    bytes_accessed = (N * Hp * W * Kw * 2          # bf16 unfolded input
                      + kh * Kw * Cout_pad * 2     # bf16 weight
                      + 2 * Cout_pad * 4           # f32 scale + bias
                      + N * H * W * Cout_pad * 4)  # f32 output

    out = pl.pallas_call(
        kernel,
        out_shape=jax.ShapeDtypeStruct((N, H * W, Cout_pad), jnp.float32),
        grid_spec=pltpu.PrefetchScalarGridSpec(
            num_scalar_prefetch=0,
            grid=grid,
            in_specs=[
                pl.BlockSpec((Nb, Hp, W, Kw), lambda n: (n, 0, 0, 0)),
                pl.BlockSpec((kh, Kw, Cout_pad), lambda n: (0, 0, 0)),   # constant: fetched once
                pl.BlockSpec((1, Cout_pad), lambda n: (0, 0)),
                pl.BlockSpec((1, Cout_pad), lambda n: (0, 0)),
            ],
            out_specs=pl.BlockSpec((Nb, H * W, Cout_pad), lambda n: (n, 0, 0)),
        ),
        compiler_params=pltpu.CompilerParams(
            dimension_semantics=("parallel",),
            vmem_limit_bytes=vmem_limit,
        ),
        cost_estimate=pl.CostEstimate(
            flops=flops, transcendentals=0, bytes_accessed=bytes_accessed),
    )(x_unf, w_unf, scale2d, bias2d)

    # Drop the lane padding and restore the NCHW module contract.
    out = out.reshape(N, H, W, Cout_pad)[..., :Cout].transpose(0, 3, 1, 2)
    return out


def make_params(key, in_channels, out_channels, kh=3, kw=3):
    k1, k2, k3, k4, k5, k6 = jax.random.split(key, 6)
    fan_in = in_channels * kh * kw
    bound = 1.0 / jnp.sqrt(fan_in)
    return {
        "conv_weight": jax.random.uniform(
            k1, (out_channels, in_channels, kh, kw), jnp.float32, -bound, bound),
        "conv_bias": jax.random.uniform(
            k2, (out_channels,), jnp.float32, -bound, bound),
        "bn_gamma": 1.0 + 0.1 * jax.random.normal(k3, (out_channels,), jnp.float32),
        "bn_beta": 0.1 * jax.random.normal(k4, (out_channels,), jnp.float32),
        "bn_running_mean": 0.1 * jax.random.normal(k5, (out_channels,), jnp.float32),
        "bn_running_var": 1.0 + 0.1 * jax.random.uniform(k6, (out_channels,), jnp.float32),
        "bn_eps": 1e-5,
    }


def _reference(x, params):
    """Pure-JAX reference (lax conv) for correctness check."""
    y = jax.lax.conv_general_dilated(
        x, params["conv_weight"], window_strides=(1, 1), padding="SAME",
        dimension_numbers=("NCHW", "OIHW", "NCHW"))
    y = y + params["conv_bias"][None, :, None, None]
    scale = params["bn_gamma"] / jnp.sqrt(params["bn_running_var"] + params["bn_eps"])
    y = (y - params["bn_running_mean"][None, :, None, None]) * scale[None, :, None, None]
    y = y + params["bn_beta"][None, :, None, None]
    return jnp.maximum(y, 0.0)


if __name__ == "__main__":
    key = jax.random.PRNGKey(0)
    kx, kp = jax.random.split(key)

    N, Cin, H, W = 2, 4, 16, 16
    Cout = 8
    x = jax.random.normal(kx, (N, Cin, H, W), jnp.float32)
    params = make_params(kp, Cin, Cout)

    fwd = jax.jit(conv_block_forward)
    out = jax.block_until_ready(fwd(x, params))
    ref = jax.block_until_ready(_reference(x, params))

    assert out.shape == (N, Cout, H, W), out.shape
    # bf16 MXU inputs (f32 accumulation, f32 BN epilogue) -> loosened tolerance.
    max_err = float(jnp.max(jnp.abs(out - ref)))
    assert jnp.allclose(out, ref, atol=3e-2, rtol=3e-2), max_err

    print("KERNEL_OK")
</pallas_src>

<mosaic_0001>
module attributes {stable_mosaic.version = 11 : i64} {
  func.func @_conv_bn_relu_kernel(%arg0: i32, %arg1: memref<1x18x16x24xbf16, #tpu.memory_space<vmem>>, %arg2: memref<3x24x128xbf16, #tpu.memory_space<vmem>>, %arg3: memref<1x128xf32, #tpu.memory_space<vmem>>, %arg4: memref<1x128xf32, #tpu.memory_space<vmem>>, %arg5: memref<1x256x128xf32, #tpu.memory_space<vmem>>) attributes {dimension_semantics = [#tpu.dimension_semantics<parallel>], iteration_bounds = array<i64: 2>, scalar_prefetch = 0 : i64, scratch_operands = 0 : i64, tpu.core_type = #tpu.core_type<tc>, window_params = [{transform_indices = @transform_0, window_bounds = array<i64: 1, 18, 16, 24>}, {pipeline_mode = #tpu.pipeline_mode<synchronous>, transform_indices = @transform_1, window_bounds = array<i64: 3, 24, 128>}, {pipeline_mode = #tpu.pipeline_mode<synchronous>, transform_indices = @transform_2, window_bounds = array<i64: 1, 128>}, {pipeline_mode = #tpu.pipeline_mode<synchronous>, transform_indices = @transform_3, window_bounds = array<i64: 1, 128>}, {transform_indices = @transform_4, window_bounds = array<i64: 1, 256, 128>}]} {
    %c0 = arith.constant 0 : index
    %c0_0 = arith.constant 0 : index
    %c0_1 = arith.constant 0 : index
    %c0_2 = arith.constant 0 : index
    %0 = vector.load %arg1[%c0, %c0_0, %c0_1, %c0_2] : memref<1x18x16x24xbf16, #tpu.memory_space<vmem>>, vector<1x16x16x24xbf16>
    %1 = vector.shape_cast %0 : vector<1x16x16x24xbf16> to vector<256x24xbf16>
    %c0_3 = arith.constant 0 : index
    %c0_4 = arith.constant 0 : index
    %c0_5 = arith.constant 0 : index
    %2 = vector.load %arg2[%c0_3, %c0_4, %c0_5] : memref<3x24x128xbf16, #tpu.memory_space<vmem>>, vector<1x24x128xbf16>
    %3 = vector.shape_cast %2 : vector<1x24x128xbf16> to vector<24x128xbf16>
    %cst = arith.constant dense<0.000000e+00> : vector<256x128xf32>
    %4 = tpu.matmul %1, %3, %cst {dimension_numbers = #tpu.dot_dimension_numbers<[1], [0], [0], [1], [0, 0, 1, 1], [], []>} : vector<256x24xbf16>, vector<24x128xbf16>, vector<256x128xf32> -> vector<256x128xf32>
    %c0_6 = arith.constant 0 : index
    %c1 = arith.constant 1 : index
    %c0_7 = arith.constant 0 : index
    %c0_8 = arith.constant 0 : index
    %5 = vector.load %arg1[%c0_6, %c1, %c0_7, %c0_8] : memref<1x18x16x24xbf16, #tpu.memory_space<vmem>>, vector<1x16x16x24xbf16>
    %6 = vector.shape_cast %5 : vector<1x16x16x24xbf16> to vector<256x24xbf16>
    %c1_9 = arith.constant 1 : index
    %c0_10 = arith.constant 0 : index
    %c0_11 = arith.constant 0 : index
    %7 = vector.load %arg2[%c1_9, %c0_10, %c0_11] : memref<3x24x128xbf16, #tpu.memory_space<vmem>>, vector<1x24x128xbf16>
    %8 = vector.shape_cast %7 : vector<1x24x128xbf16> to vector<24x128xbf16>
    %cst_12 = arith.constant dense<0.000000e+00> : vector<256x128xf32>
    %9 = tpu.matmul %6, %8, %cst_12 {dimension_numbers = #tpu.dot_dimension_numbers<[1], [0], [0], [1], [0, 0, 1, 1], [], []>} : vector<256x24xbf16>, vector<24x128xbf16>, vector<256x128xf32> -> vector<256x128xf32>
    %10 = arith.addf %4, %9 : vector<256x128xf32>
    %c0_13 = arith.constant 0 : index
    %c2 = arith.constant 2 : index
    %c0_14 = arith.constant 0 : index
    %c0_15 = arith.constant 0 : index
    %11 = vector.load %arg1[%c0_13, %c2, %c0_14, %c0_15] : memref<1x18x16x24xbf16, #tpu.memory_space<vmem>>, vector<1x16x16x24xbf16>
    %12 = vector.shape_cast %11 : vector<1x16x16x24xbf16> to vector<256x24xbf16>
    %c2_16 = arith.constant 2 : index
    %c0_17 = arith.constant 0 : index
    %c0_18 = arith.constant 0 : index
    %13 = vector.load %arg2[%c2_16, %c0_17, %c0_18] : memref<3x24x128xbf16, #tpu.memory_space<vmem>>, vector<1x24x128xbf16>
    %14 = vector.shape_cast %13 : vector<1x24x128xbf16> to vector<24x128xbf16>
    %cst_19 = arith.constant dense<0.000000e+00> : vector<256x128xf32>
    %15 = tpu.matmul %12, %14, %cst_19 {dimension_numbers = #tpu.dot_dimension_numbers<[1], [0], [0], [1], [0, 0, 1, 1], [], []>} : vector<256x24xbf16>, vector<24x128xbf16>, vector<256x128xf32> -> vector<256x128xf32>
    %16 = arith.addf %10, %15 : vector<256x128xf32>
    %c0_20 = arith.constant 0 : index
    %c0_21 = arith.constant 0 : index
    %17 = vector.load %arg3[%c0_20, %c0_21] : memref<1x128xf32, #tpu.memory_space<vmem>>, vector<1x128xf32>
    %18 = vector.broadcast %17 : vector<1x128xf32> to vector<256x128xf32>
    %19 = arith.mulf %16, %18 : vector<256x128xf32>
    %c0_22 = arith.constant 0 : index
    %c0_23 = arith.constant 0 : index
    %20 = vector.load %arg4[%c0_22, %c0_23] : memref<1x128xf32, #tpu.memory_space<vmem>>, vector<1x128xf32>
    %21 = vector.broadcast %20 : vector<1x128xf32> to vector<256x128xf32>
    %22 = arith.addf %19, %21 : vector<256x128xf32>
    %cst_24 = arith.constant 0.000000e+00 : f32
    %23 = vector.broadcast %cst_24 : f32 to vector<256x128xf32>
    %24 = arith.maximumf %22, %23 : vector<256x128xf32>
    %25 = vector.shape_cast %24 : vector<256x128xf32> to vector<1x256x128xf32>
    %c0_25 = arith.constant 0 : index
    %c0_26 = arith.constant 0 : index
    %c0_27 = arith.constant 0 : index
    %26 = vector.load %arg5[%c0_25, %c0_26, %c0_27] : memref<1x256x128xf32, #tpu.memory_space<vmem>>, vector<1x256x128xf32>
    tpu.vector_store %arg5[%c0_25, %c0_26, %c0_27], %25 {strides = array<i32>} : memref<1x256x128xf32, #tpu.memory_space<vmem>>, vector<1x256x128xf32>,
    return
  }
  func.func @transform_0(%arg0: i32) -> (i32, i32, i32, i32) {
    %c0_i32 = arith.constant 0 : i32
    %c0_i32_0 = arith.constant 0 : i32
    %c0_i32_1 = arith.constant 0 : i32
    %c0_i32_2 = arith.constant 0 : i32
    return %arg0, %c0_i32, %c0_i32_0, %c0_i32_1 : i32, i32, i32, i32
  }
  func.func @transform_1(%arg0: i32) -> (i32, i32, i32) {
    %c0_i32 = arith.constant 0 : i32
    %c0_i32_0 = arith.constant 0 : i32
    %c0_i32_1 = arith.constant 0 : i32
    %c0_i32_2 = arith.constant 0 : i32
    return %c0_i32, %c0_i32_0, %c0_i32_1 : i32, i32, i32
  }
  func.func @transform_2(%arg0: i32) -> (i32, i32) {
    %c0_i32 = arith.constant 0 : i32
    %c0_i32_0 = arith.constant 0 : i32
    %c0_i32_1 = arith.constant 0 : i32
    return %c0_i32, %c0_i32_0 : i32, i32
  }
  func.func @transform_3(%arg0: i32) -> (i32, i32) {
    %c0_i32 = arith.constant 0 : i32
    %c0_i32_0 = arith.constant 0 : i32
    %c0_i32_1 = arith.constant 0 : i32
    return %c0_i32, %c0_i32_0 : i32, i32
  }
  func.func @transform_4(%arg0: i32) -> (i32, i32, i32) {
    %c0_i32 = arith.constant 0 : i32
    %c0_i32_0 = arith.constant 0 : i32
    %c0_i32_1 = arith.constant 0 : i32
    return %arg0, %c0_i32, %c0_i32_0 : i32, i32, i32
  }
}

</mosaic_0001>

<bundles_post_ra>
// kernel: conv_block_forward.1
= control target key start
LH: loop header
LB: loop body
LE: loop exit
PB: predicated region body
PF: predicated region fallthrough
CT: control target
= control target key end

     0   :  { %s1893_s15 = smov 0   ;;  %s2223_s0 = inlined_call_operand.vmem [shape: bf16[2,18,16,24], index: 0, kind: input, shape index: {}]   ;;  %s2224_s1 = inlined_call_operand.vmem [shape: bf16[3,24,128], index: 1, kind: input, shape index: {}]   ;;  %s2225_s2 = inlined_call_operand.vmem [shape: f32[1,128], index: 2, kind: input, shape index: {}]   ;;  %s2226_s3 = inlined_call_operand.vmem [shape: f32[1,128], index: 3, kind: input, shape index: {}]   ;;  %s2227_s4 = inlined_call_operand.vmem [shape: f32[2,256,128], index: 4, kind: output, shape index: {}]  }
   0x1 LB: > { %s1442_s16 = sadd.s32 4294967295, %s1866_s15   ;;  %p1446_p0 = scmp.ge.s32.totalorder %s1866_s15, 1  ;;  %s1866_s15 = sphi %s1893_s15, %s14_s15  }
   0x2   : > { %p162_p1 = scmp.lt.s32.totalorder %s1866_s15, 3 }
   0x4   : > { %p163_p2 = pnand %p1446_p0, %p162_p1 }
   0x5   : > { %p188_p3 = scmp.lt.s32.totalorder (!%p163_p2), %s1442_s16, 1 }
   0x6   : > { %166 = sbr.rel (%p163_p2) target bundleno = 318 (0x13e), region = 36 }
   0xb   : > { %v1806_v0 = vld [vmem:[%s2224_s1 + $0x14] ss:$0 sps:$4 sm:$0xff]   ;;  %vm409_vm0 = vcmask 1043456   ;;  %v1807_v1 = vld [vmem:[%s2224_s1 + $0xc] sm:$0xff]   ;;  %s2229_s16 = smov (!%p188_p3, %s1442_s16), 1  ;;  %vm360_vm1 = vcmask 195584  }
   0xc   : > { %1793 = vmatprep.subr.msk.bf16.mxu0 %vm409_vm0, %v1806_v0  ;;  %1794 = vmatprep.subr.msk.bf16.mxu1 %vm409_vm0, %v1806_v0  ;;  %v411_v2 = vsel %vm409_vm0, %v1806_v0, 0  ;;  %v1812_v3 = vld [vmem:[%s2224_s1 + $0x8] ss:$0 sps:$4 sm:$0xff]   ;;  %v1813_v4 = vld [vmem:[%s2224_s1 + $0x20] ss:$0 sps:$4 sm:$0xff]   ;;  %s1797_s25 = smul.u32 144, %s2229_s16 }
   0xd   : > { %1682 = vmatpush3.bf16.msra.mxu0 %v411_v2  ;;  %1791 = vmatpush3.bf16.msra.mxu1 %v411_v2  ;;  %v1822_v7 = vld [vmem:[%s2224_s1] sm:$0xff]   ;;  %v1050_v9 = vsel %vm409_vm0, %v1813_v4, 0  ;;  %v1823_v10 = vld [vmem:[%s2224_s1 + $0x18] sm:$0xff]   ;;  %v712_v12 = vsel %vm409_vm0, %v1812_v3, 0  ;;  %s1626_s11 = sshll.u32 %s2229_s16, 8 }
   0xe   : > { %1683 = vmatprep.subr.bf16.mxu0 %v1807_v1  ;;  %1790 = vmatprep.subr.bf16.mxu1 %v1807_v1  ;;  %s1922_s28 = scalar_lea.vmem %s2223_s0, %s1797_s25  ;;  %s2099_s14 = scalar_lea.vmem %s2227_s4, %s1626_s11 }
   0xf   : > { %v1808_v5 = vld [vmem:[%s1922_s28 + $0x8] sm:$0xff]   ;;  %v1810_v8 = vld [vmem:[%s1922_s28 + $0x10] sm:$0xff]   ;;  %v1814_v13 = vld [vmem:[%s1922_s28 + $0x18] sm:$0xff]  }
  0x10   : > { %v1809_v6 = vld [vmem:[%s1922_s28 + $0x48] sm:$0xff]   ;;  %1685 = vmatprep.mubr.msk.bf16.mxu0 %vm360_vm1, %v1808_v5  ;;  %v1811_v11 = vld [vmem:[%s1922_s28 + $0x50] sm:$0xff]   ;;  %v1815_v14 = vld [vmem:[%s1922_s28 + $0x58] sm:$0xff]  }
  0x11   : > { %1684 = vmatpush3.bf16.msra.mxu0 %v1807_v1  ;;  %1792 = vmatpush3.bf16.msra.mxu1 %v1807_v1  ;;  %v1816_v15 = vld [vmem:[%s1922_s28 + $0x20] sm:$0xff]   ;;  %v1818_v17 = vld [vmem:[%s1922_s28 + $0x28] sm:$0xff]   ;;  %v1820_v19 = vld [vmem:[%s1922_s28 + $0x30] sm:$0xff]  }
  0x12   : > { %1795 = vmatprep.subr.msk.bf16.mxu1 %vm409_vm0, %v1812_v3  ;;  %1796 = vmatprep.subr.msk.bf16.mxu0 %vm409_vm0, %v1813_v4  ;;  %v1817_v16 = vld [vmem:[%s1922_s28 + $0x60] sm:$0xff]   ;;  %v1819_v18 = vld [vmem:[%s1922_s28 + $0x68] sm:$0xff]   ;;  %v1821_v20 = vld [vmem:[%s1922_s28 + $0x70] sm:$0xff]  }
  0x13   : > { %1701 = vmatprep.mubr.msk.bf16.mxu1 %vm360_vm1, %v1809_v6  ;;  %v1824_v21 = vld [vmem:[%s1922_s28 + $0x38] sm:$0xff]   ;;  %v1826_v23 = vld [vmem:[%s1922_s28 + $0x40] sm:$0xff]   ;;  %v1829_v25 = vld [vmem:[%s1922_s28 + $0x10] sm:$0xff]  }
  0x14   : > { %1686 = vmatmul.mubr.msk.bf16.vlgmr.msra.gmra.mxu0 %vm360_vm1, %v1810_v8  ;;  %1702 = vmatmul.mubr.msk.bf16.vlgmr.msra.gmra.mxu1 %vm360_vm1, %v1811_v11  ;;  %v1825_v22 = vld [vmem:[%s1922_s28 + $0x78] sm:$0xff]   ;;  %v1827_v24 = vld [vmem:[%s1922_s28 + $0x80] sm:$0xff]   ;;  %v1830_v27 = vld [vmem:[%s1922_s28 + $0x8] sm:$0xff]  }
  0x15   : > { %1754 = vmatpush3.bf16.msra.mxu0 %v1050_v9  ;;  %1718 = vmatpush3.bf16.msra.mxu1 %v712_v12  ;;  %v1828_v26 = vld [vmem:[%s1922_s28] sm:$0xff]   ;;  %v1831_v28 = vld [vmem:[%s1922_s28 + $0x18] sm:$0xff]   ;;  %v1832_v30 = vld [vmem:[%s1922_s28 + $0x10] sm:$0xff]  }
  0x16   : > { %1689 = vmatprep.mubr.msk.bf16.mxu0 %vm360_vm1, %v1814_v13  ;;  %1705 = vmatprep.mubr.msk.bf16.mxu1 %vm360_vm1, %v1815_v14  ;;  %v1833_v29 = vld [vmem:[%s1922_s28 + $0x20] sm:$0xff]   ;;  %v1834_v31 = vld [vmem:[%s1922_s28 + $0x18] sm:$0xff]   ;;  %v1835_v32 = vld [vmem:[%s1922_s28 + $0x28] sm:$0xff]  }
  0x17   : > { %1719 = vmatprep.subr.bf16.mxu1 %v1822_v7  ;;  %1755 = vmatprep.subr.bf16.mxu0 %v1823_v10  ;;  %v1837_v33 = vld [vmem:[%s1922_s28 + $0x30] sm:$0xff]   ;;  %v1836_v34 = vld [vmem:[%s1922_s28 + $0x20] sm:$0xff]   ;;  %v1839_v35 = vld [vmem:[%s1922_s28 + $0x38] sm:$0xff]  }
  0x18   : > { %v1838_v36 = vld [vmem:[%s1922_s28 + $0x28] sm:$0xff]   ;;  %v1841_v37 = vld [vmem:[%s1922_s28 + $0x40] sm:$0xff]   ;;  %v1840_v38 = vld [vmem:[%s1922_s28 + $0x30] sm:$0xff]  }
  0x19   : > { %1756 = vmatpush3.bf16.msra.mxu0 %v1823_v10  ;;  %1720 = vmatpush3.bf16.msra.mxu1 %v1822_v7  ;;  %v1843_v39 = vld [vmem:[%s1922_s28 + $0x48] sm:$0xff]   ;;  %v1842_v40 = vld [vmem:[%s1922_s28 + $0x38] sm:$0xff]   ;;  %v1845_v41 = vld [vmem:[%s1922_s28 + $0x50] sm:$0xff]  }
  0x1a   : > { %v1844_v42 = vld [vmem:[%s1922_s28 + $0x40] sm:$0xff]   ;;  %v1847_v43 = vld [vmem:[%s1922_s28 + $0x58] sm:$0xff]   ;;  %v1846_v44 = vld [vmem:[%s1922_s28 + $0x48] sm:$0xff]  }
  0x1b   : > { %v1849_v45 = vld [vmem:[%s1922_s28 + $0x60] sm:$0xff]   ;;  %v1848_v46 = vld [vmem:[%s1922_s28 + $0x50] sm:$0xff]   ;;  %v1851_v47 = vld [vmem:[%s1922_s28 + $0x68] sm:$0xff]  }
  0x1c   : > { %1690 = vmatmul.mubr.msk.bf16.gmra.mxu0 %vm360_vm1, %v1816_v15  ;;  %1706 = vmatmul.mubr.msk.bf16.gmra.mxu1 %vm360_vm1, %v1817_v16  ;;  %v1850_v48 = vld [vmem:[%s1922_s28 + $0x58] sm:$0xff]   ;;  %v1853_v49 = vld [vmem:[%s1922_s28 + $0x70] sm:$0xff]   ;;  %v1852_v50 = vld [vmem:[%s1922_s28 + $0x60] sm:$0xff]  }
  0x1d   : > { %1693 = vmatprep.mubr.msk.bf16.mxu0 %vm360_vm1, %v1818_v17  ;;  %1709 = vmatprep.mubr.msk.bf16.mxu1 %vm360_vm1, %v1819_v18  ;;  %v1855_v51 = vld [vmem:[%s1922_s28 + $0x78] sm:$0xff]   ;;  %v1854_v52 = vld [vmem:[%s1922_s28 + $0x68] sm:$0xff]   ;;  %v1857_v53 = vld [vmem:[%s1922_s28 + $0x80] sm:$0xff]  }
  0x1e   : > { %v1856_v54 = vld [vmem:[%s1922_s28 + $0x70] sm:$0xff]   ;;  %v1859_v55 = vld [vmem:[%s1922_s28 + $0x88] sm:$0xff]   ;;  %v1858_v56 = vld [vmem:[%s1922_s28 + $0x78] sm:$0xff]  }
  0x24   : > { %1694 = vmatmul.mubr.msk.bf16.gmra.mxu0 %vm360_vm1, %v1820_v19  ;;  %1710 = vmatmul.mubr.msk.bf16.gmra.mxu1 %vm360_vm1, %v1821_v20 }
  0x25   : > { %1697 = vmatprep.mubr.msk.bf16.mxu0 %vm360_vm1, %v1824_v21  ;;  %1713 = vmatprep.mubr.msk.bf16.mxu1 %vm360_vm1, %v1825_v22 }
  0x2c   : > { %1698 = vmatmul.mubr.msk.bf16.gmra.mxu0 %vm360_vm1, %v1826_v23  ;;  %1714 = vmatmul.mubr.msk.bf16.gmra.mxu1 %vm360_vm1, %v1827_v24 }
  0x2d   : > { %1757 = vmatprep.mubr.msk.bf16.mxu0 %vm360_vm1, %v1829_v25  ;;  %1721 = vmatprep.mubr.msk.bf16.mxu1 %vm360_vm1, %v1828_v26 }
  0x34   : > { %1758 = vmatmul.mubr.msk.bf16.vlgmr.msra.gmra.mxu0 %vm360_vm1, %v1831_v28  ;;  %1722 = vmatmul.mubr.msk.bf16.vlgmr.msra.gmra.mxu1 %vm360_vm1, %v1830_v27 }
  0x35   : > { %1761 = vmatprep.mubr.msk.bf16.mxu0 %vm360_vm1, %v1833_v29  ;;  %1725 = vmatprep.mubr.msk.bf16.mxu1 %vm360_vm1, %v1832_v30  ;;  %v2085_v29 = vld [vmem:[%s2225_s2] ss:$0 sm:$0xff] }
  0x3c   : > { %1762 = vmatmul.mubr.msk.bf16.gmra.mxu0 %vm360_vm1, %v1835_v32  ;;  %1726 = vmatmul.mubr.msk.bf16.gmra.mxu1 %vm360_vm1, %v1834_v31 }
  0x3d   : > { %1765 = vmatprep.mubr.msk.bf16.mxu0 %vm360_vm1, %v1837_v33  ;;  %1729 = vmatprep.mubr.msk.bf16.mxu1 %vm360_vm1, %v1836_v34  ;;  %v2090_v34 = vld [vmem:[%s2226_s3] ss:$0 sm:$0xff] }
  0x44   : > { %1766 = vmatmul.mubr.msk.bf16.gmra.mxu0 %vm360_vm1, %v1839_v35  ;;  %1730 = vmatmul.mubr.msk.bf16.gmra.mxu1 %vm360_vm1, %v1838_v36 }
  0x45   : > { %1769 = vmatprep.mubr.msk.bf16.mxu0 %vm360_vm1, %v1841_v37  ;;  %1733 = vmatprep.mubr.msk.bf16.mxu1 %vm360_vm1, %v1840_v38 }
  0x4c   : > { %1770 = vmatmul.mubr.msk.bf16.gmra.mxu0 %vm360_vm1, %v1843_v39  ;;  %1734 = vmatmul.mubr.msk.bf16.gmra.mxu1 %vm360_vm1, %v1842_v40 }
  0x4d   : > { %1773 = vmatprep.mubr.msk.bf16.mxu0 %vm360_vm1, %v1845_v41  ;;  %1737 = vmatprep.mubr.msk.bf16.mxu1 %vm360_vm1, %v1844_v42 }
  0x54   : > { %1774 = vmatmul.mubr.msk.bf16.gmra.mxu0 %vm360_vm1, %v1847_v43  ;;  %1738 = vmatmul.mubr.msk.bf16.gmra.mxu1 %vm360_vm1, %v1846_v44 }
  0x55   : > { %1777 = vmatprep.mubr.msk.bf16.mxu0 %vm360_vm1, %v1849_v45  ;;  %1741 = vmatprep.mubr.msk.bf16.mxu1 %vm360_vm1, %v1848_v46 }
  0x5c   : > { %1778 = vmatmul.mubr.msk.bf16.gmra.mxu0 %vm360_vm1, %v1851_v47  ;;  %1742 = vmatmul.mubr.msk.bf16.gmra.mxu1 %vm360_vm1, %v1850_v48 }
  0x5d   : > { %1781 = vmatprep.mubr.msk.bf16.mxu0 %vm360_vm1, %v1853_v49  ;;  %1745 = vmatprep.mubr.msk.bf16.mxu1 %vm360_vm1, %v1852_v50 }
  0x64   : > { %1782 = vmatmul.mubr.msk.bf16.gmra.mxu0 %vm360_vm1, %v1855_v51  ;;  %1746 = vmatmul.mubr.msk.bf16.gmra.mxu1 %vm360_vm1, %v1854_v52 }
  0x65   : > { %1785 = vmatprep.mubr.msk.bf16.mxu0 %vm360_vm1, %v1857_v53  ;;  %1749 = vmatprep.mubr.msk.bf16.mxu1 %vm360_vm1, %v1856_v54 }
  0x6c   : > { %1786 = vmatmul.mubr.msk.bf16.gmra.mxu0 %vm360_vm1, %v1859_v55  ;;  %1750 = vmatmul.mubr.msk.bf16.gmra.mxu1 %vm360_vm1, %v1858_v56 }
  0xd4   : > { %v1687_v57 = vpop.f32.mrf.mxu0  ;;  %v2030_v58 = vpop.f32.mrf.mxu1 }
  0xd6   : > { %v447_v59 = vpop.f32.mrf.mxu0  ;;  %v2032_v60 = vpop.f32.mrf.mxu1 }
  0xd8   : > { %v1688_v61 = vpop.f32.mrf.mxu0  ;;  %v2034_v62 = vpop.f32.mrf.mxu1 }
  0xda   : > { %v450_v63 = vpop.f32.mrf.mxu0  ;;  %v2036_v0 = vpop.f32.mrf.mxu1 }
  0xdc   : > { %v1691_v1 = vpop.f32.mrf.mxu0  ;;  %v2038_v2 = vpop.f32.mrf.mxu1 }
  0xde   : > { %v463_v3 = vpop.f32.mrf.mxu0  ;;  %v2040_v4 = vpop.f32.mrf.mxu1 }
  0xe0   : > { %v2042_v5 = vpop.f32.mrf.mxu0  ;;  %v2044_v6 = vpop.f32.mrf.mxu1 }
  0xe2   : > { %v2046_v7 = vpop.f32.mrf.mxu0  ;;  %v2048_v8 = vpop.f32.mrf.mxu1 }
  0xe4   : > { %v2050_v9 = vpop.f32.mrf.mxu0  ;;  %v2052_v10 = vpop.f32.mrf.mxu1 }
  0xe6   : > { %v2054_v11 = vpop.f32.mrf.mxu0  ;;  %v2056_v12 = vpop.f32.mrf.mxu1 }
  0xe8   : > { %v2058_v13 = vpop.f32.mrf.mxu0  ;;  %v2060_v14 = vpop.f32.mrf.mxu1 }
  0xea   : > { %v2062_v15 = vpop.f32.mrf.mxu0  ;;  %v2064_v16 = vpop.f32.mrf.mxu1 }
  0xec   : > { %v2066_v17 = vpop.f32.mrf.mxu0  ;;  %v2068_v18 = vpop.f32.mrf.mxu1 }
  0xee   : > { %v2070_v19 = vpop.f32.mrf.mxu0  ;;  %v2072_v20 = vpop.f32.mrf.mxu1 }
  0xf0   : > { %v2074_v21 = vpop.f32.mrf.mxu0  ;;  %v2076_v22 = vpop.f32.mrf.mxu1 }
  0xf2   : > { %v2078_v23 = vpop.f32.mrf.mxu0  ;;  %v2080_v24 = vpop.f32.mrf.mxu1 }
  0xf4   : > { %v1759_v25 = vpop.f32.mrf.mxu0  ;;  %v1723_v26 = vpop.f32.mrf.mxu1 }
  0xf5   : > { %v757_v27 = vadd.f32 %v1723_v26, %v1687_v57 }
  0xf6   : > { %v1086_v28 = vpop.f32.mrf.mxu0  ;;  %v748_v30 = vpop.f32.mrf.mxu1 }
  0xf7   : > { %v1215_v31 = vadd.f32 %v1759_v25, %v757_v27  ;;  %v749_v32 = vadd.f32 %v748_v30, %v447_v59 }
  0xf8   : > { %v1760_v33 = vpop.f32.mrf.mxu0  ;;  %v1724_v35 = vpop.f32.mrf.mxu1 }
  0xf9   : > { %v1254_v36 = vmul.f32 %v2085_v29, %v1215_v31  ;;  %v1213_v37 = vadd.f32 %v1086_v28, %v749_v32  ;;  %v760_v38 = vadd.f32 %v1724_v35, %v1688_v61 }
  0xfa   : > { %v1089_v39 = vpop.f32.mrf.mxu0  ;;  %v751_v40 = vpop.f32.mrf.mxu1 }
  0xfb   : > { %v1293_v41 = vadd.f32 %v2090_v34, %v1254_v36  ;;  %v1252_v42 = vmul.f32 %v2085_v29, %v1213_v37  ;;  %v1216_v43 = vadd.f32 %v1760_v33, %v760_v38  ;;  %v752_v44 = vadd.f32 %v751_v40, %v450_v63 }
  0xfc   : > { %v1763_v45 = vpop.f32.mrf.mxu0  ;;  %v1727_v46 = vpop.f32.mrf.mxu1 }
  0xfd   : > { %v1325_v47 = vmax.f32 %v1293_v41, 0.0  ;;  %v1291_v48 = vadd.f32 %v2090_v34, %v1252_v42  ;;  %v1255_v49 = vmul.f32 %v2085_v29, %v1216_v43  ;;  %v1214_v50 = vadd.f32 %v1089_v39, %v752_v44 }
  0xfe   : > { %v1102_v51 = vpop.f32.mrf.mxu0  ;;  %v773_v52 = vadd.f32 %v1727_v46, %v1691_v1  ;;  %v764_v53 = vpop.f32.mrf.mxu1 }
  0xff   : > { %1357 = vst [vmem:[%s2099_s14 + $0x10] sm:$0xff] %v1325_v47  ;;  %v1323_v54 = vmax.f32 %v1291_v48, 0.0  ;;  %v1294_v55 = vadd.f32 %v2090_v34, %v1255_v49  ;;  %v1253_v56 = vmul.f32 %v2085_v29, %v1214_v50  ;;  %v765_v57 = vadd.f32 %v764_v53, %v463_v3 }
 0x100   : > { %v1764_v59 = vpop.f32.mrf.mxu0  ;;  %v1219_v61 = vadd.f32 %v1763_v45, %v773_v52  ;;  %v1728_v63 = vpop.f32.mrf.mxu1 }
 0x101   : > { %1355 = vst [vmem:[%s2099_s14] sm:$0xff] %v1323_v54  ;;  %v1326_v25 = vmax.f32 %v1294_v55, 0.0  ;;  %v1292_v26 = vadd.f32 %v2090_v34, %v1253_v56  ;;  %v1217_v27 = vadd.f32 %v1102_v51, %v765_v57  ;;  %v776_v1 = vadd.f32 %v1728_v63, %v2042_v5 }
 0x102   : > { %v1105_v28 = vpop.f32.mrf.mxu0  ;;  %v1258_v30 = vmul.f32 %v2085_v29, %v1219_v61  ;;  %v767_v31 = vpop.f32.mrf.mxu1 }
 0x103   : > { %1358 = vst [vmem:[%s2099_s14 + $0x18] sm:$0xff] %v1326_v25  ;;  %v1324_v32 = vmax.f32 %v1292_v26, 0.0  ;;  %v1256_v33 = vmul.f32 %v2085_v29, %v1217_v27  ;;  %v1220_v3 = vadd.f32 %v1764_v59, %v776_v1  ;;  %v768_v35 = vadd.f32 %v767_v31, %v2046_v7 }
 0x104   : > { %v1767_v36 = vpop.f32.mrf.mxu0  ;;  %v1297_v37 = vadd.f32 %v2090_v34, %v1258_v30  ;;  %v1731_v38 = vpop.f32.mrf.mxu1 }
 0x105   : > { %1356 = vst [vmem:[%s2099_s14 + $0x8] sm:$0xff] %v1324_v32  ;;  %v1295_v5 = vadd.f32 %v2090_v34, %v1256_v33  ;;  %v1259_v39 = vmul.f32 %v2085_v29, %v1220_v3  ;;  %v1218_v40 = vadd.f32 %v1105_v28, %v768_v35  ;;  %v789_v41 = vadd.f32 %v1731_v38, %v2050_v9 }
 0x106   : > { %v1118_v42 = vpop.f32.mrf.mxu0  ;;  %v1329_v43 = vmax.f32 %v1297_v37, 0.0  ;;  %v780_v44 = vpop.f32.mrf.mxu1 }
 0x107   : > { %v1327_v45 = vmax.f32 %v1295_v5, 0.0  ;;  %v1298_v7 = vadd.f32 %v2090_v34, %v1259_v39  ;;  %v1257_v46 = vmul.f32 %v2085_v29, %v1218_v40  ;;  %v1223_v47 = vadd.f32 %v1767_v36, %v789_v41 }
 0x108   : > { %v1768_v48 = vpop.f32.mrf.mxu0  ;;  %1361 = vst [vmem:[%s2099_s14 + $0x30] sm:$0xff] %v1329_v43  ;;  %v781_v49 = vadd.f32 %v780_v44, %v2054_v11  ;;  %v1732_v50 = vpop.f32.mrf.mxu1 }
 0x109   : > { %1359 = vst [vmem:[%s2099_s14 + $0x20] sm:$0xff] %v1327_v45  ;;  %v1330_v51 = vmax.f32 %v1298_v7, 0.0  ;;  %v1296_v9 = vadd.f32 %v2090_v34, %v1257_v46  ;;  %v1262_v52 = vmul.f32 %v2085_v29, %v1223_v47  ;;  %v792_v53 = vadd.f32 %v1732_v50, %v2058_v13 }
 0x10a   : > { %v1121_v54 = vpop.f32.mrf.mxu0  ;;  %v1221_v55 = vadd.f32 %v1118_v42, %v781_v49  ;;  %v783_v56 = vpop.f32.mrf.mxu1 }
 0x10b   : > { %1362 = vst [vmem:[%s2099_s14 + $0x38] sm:$0xff] %v1330_v51  ;;  %v1328_v57 = vmax.f32 %v1296_v9, 0.0  ;;  %v1301_v59 = vadd.f32 %v2090_v34, %v1262_v52  ;;  %v1224_v61 = vadd.f32 %v1768_v48, %v792_v53  ;;  %v784_v11 = vadd.f32 %v783_v56, %v2062_v15 }
 0x10c   : > { %v1771_v63 = vpop.f32.mrf.mxu0  ;;  %v1260_v25 = vmul.f32 %v2085_v29, %v1221_v55  ;;  %v1735_v26 = vpop.f32.mrf.mxu1 }
 0x10d   : > { %1360 = vst [vmem:[%s2099_s14 + $0x28] sm:$0xff] %v1328_v57  ;;  %v1333_v27 = vmax.f32 %v1301_v59, 0.0  ;;  %v1263_v1 = vmul.f32 %v2085_v29, %v1224_v61  ;;  %v1222_v13 = vadd.f32 %v1121_v54, %v784_v11  ;;  %v805_v28 = vadd.f32 %v1735_v26, %v2066_v17 }
 0x10e   : > { %v1134_v30 = vpop.f32.mrf.mxu0  ;;  %v1299_v31 = vadd.f32 %v2090_v34, %v1260_v25  ;;  %v796_v32 = vpop.f32.mrf.mxu1 }
 0x10f   : > { %1365 = vst [vmem:[%s2099_s14 + $0x50] sm:$0xff] %v1333_v27  ;;  %v1302_v15 = vadd.f32 %v2090_v34, %v1263_v1  ;;  %v1261_v33 = vmul.f32 %v2085_v29, %v1222_v13  ;;  %v1227_v3 = vadd.f32 %v1771_v63, %v805_v28  ;;  %v797_v35 = vadd.f32 %v796_v32, %v2070_v19 }
 0x110   : > { %v1772_v36 = vpop.f32.mrf.mxu0  ;;  %v1331_v37 = vmax.f32 %v1299_v31, 0.0  ;;  %v1736_v38 = vpop.f32.mrf.mxu1 }
 0x111   : > { %v1334_v5 = vmax.f32 %v1302_v15, 0.0  ;;  %v1300_v17 = vadd.f32 %v2090_v34, %v1261_v33  ;;  %v1266_v39 = vmul.f32 %v2085_v29, %v1227_v3  ;;  %v1225_v40 = vadd.f32 %v1134_v30, %v797_v35 }
 0x112   : > { %v1137_v41 = vpop.f32.mrf.mxu0  ;;  %1363 = vst [vmem:[%s2099_s14 + $0x40] sm:$0xff] %v1331_v37  ;;  %v808_v42 = vadd.f32 %v1736_v38, %v2074_v21  ;;  %v799_v43 = vpop.f32.mrf.mxu1 }
 0x113   : > { %1366 = vst [vmem:[%s2099_s14 + $0x58] sm:$0xff] %v1334_v5  ;;  %v1332_v44 = vmax.f32 %v1300_v17, 0.0  ;;  %v1305_v19 = vadd.f32 %v2090_v34, %v1266_v39  ;;  %v1264_v45 = vmul.f32 %v2085_v29, %v1225_v40  ;;  %v800_v7 = vadd.f32 %v799_v43, %v2078_v23 }
 0x114   : > { %v1775_v46 = vpop.f32.mrf.mxu0  ;;  %v1228_v47 = vadd.f32 %v1772_v36, %v808_v42  ;;  %v1739_v48 = vpop.f32.mrf.mxu1 }
 0x115   : > { %1364 = vst [vmem:[%s2099_s14 + $0x48] sm:$0xff] %v1332_v44  ;;  %v1337_v49 = vmax.f32 %v1305_v19, 0.0  ;;  %v1303_v50 = vadd.f32 %v2090_v34, %v1264_v45  ;;  %v1226_v51 = vadd.f32 %v1137_v41, %v800_v7  ;;  %v821_v21 = vadd.f32 %v1739_v48, %v2030_v58 }
 0x116   : > { %v1150_v9 = vpop.f32.mrf.mxu0  ;;  %v1267_v52 = vmul.f32 %v2085_v29, %v1228_v47  ;;  %v812_v53 = vpop.f32.mrf.mxu1 }
 0x117   : > { %1369 = vst [vmem:[%s2099_s14 + $0x70] sm:$0xff] %v1337_v49  ;;  %v1335_v54 = vmax.f32 %v1303_v50, 0.0  ;;  %v1265_v55 = vmul.f32 %v2085_v29, %v1226_v51  ;;  %v1231_v23 = vadd.f32 %v1775_v46, %v821_v21  ;;  %v813_v56 = vadd.f32 %v812_v53, %v2032_v60 }
 0x118   : > { %v1776_v57 = vpop.f32.mrf.mxu0  ;;  %v1306_v59 = vadd.f32 %v2090_v34, %v1267_v52  ;;  %v1740_v61 = vpop.f32.mrf.mxu1 }
 0x119   : > { %1367 = vst [vmem:[%s2099_s14 + $0x60] sm:$0xff] %v1335_v54  ;;  %v1304_v58 = vadd.f32 %v2090_v34, %v1265_v55  ;;  %v1270_v11 = vmul.f32 %v2085_v29, %v1231_v23  ;;  %v1229_v63 = vadd.f32 %v1150_v9, %v813_v56  ;;  %v824_v25 = vadd.f32 %v1740_v61, %v2034_v62 }
 0x11a   : > { %v1153_v26 = vpop.f32.mrf.mxu0  ;;  %v1338_v27 = vmax.f32 %v1306_v59, 0.0  ;;  %v815_v1 = vpop.f32.mrf.mxu1 }
 0x11b   : > { %v1336_v13 = vmax.f32 %v1304_v58, 0.0  ;;  %v1309_v60 = vadd.f32 %v2090_v34, %v1270_v11  ;;  %v1268_v28 = vmul.f32 %v2085_v29, %v1229_v63  ;;  %v1232_v30 = vadd.f32 %v1776_v57, %v824_v25 }
 0x11c   : > { %v1779_v31 = vpop.f32.mrf.mxu0  ;;  %1370 = vst [vmem:[%s2099_s14 + $0x78] sm:$0xff] %v1338_v27  ;;  %v816_v32 = vadd.f32 %v815_v1, %v2036_v0  ;;  %v1743_v15 = vpop.f32.mrf.mxu1 }
 0x11d   : > { %1368 = vst [vmem:[%s2099_s14 + $0x68] sm:$0xff] %v1336_v13  ;;  %v1341_v33 = vmax.f32 %v1309_v60, 0.0  ;;  %v1307_v62 = vadd.f32 %v2090_v34, %v1268_v28  ;;  %v1271_v3 = vmul.f32 %v2085_v29, %v1232_v30  ;;  %v837_v35 = vadd.f32 %v1743_v15, %v2038_v2 }
 0x11e   : > { %v1166_v36 = vpop.f32.mrf.mxu0  ;;  %v1230_v37 = vadd.f32 %v1153_v26, %v816_v32  ;;  %v828_v38 = vpop.f32.mrf.mxu1 }
 0x11f   : > { %1373 = vst [vmem:[%s2099_s14 + $0x90] sm:$0xff] %v1341_v33  ;;  %v1339_v5 = vmax.f32 %v1307_v62, 0.0  ;;  %v1310_v17 = vadd.f32 %v2090_v34, %v1271_v3  ;;  %v1235_v39 = vadd.f32 %v1779_v31, %v837_v35  ;;  %v829_v0 = vadd.f32 %v828_v38, %v2040_v4 }
 0x120   : > { %v1780_v40 = vpop.f32.mrf.mxu0  ;;  %v1269_v41 = vmul.f32 %v2085_v29, %v1230_v37  ;;  %v1744_v42 = vpop.f32.mrf.mxu1 }
 0x121   : > { %1371 = vst [vmem:[%s2099_s14 + $0x80] sm:$0xff] %v1339_v5  ;;  %v1342_v43 = vmax.f32 %v1310_v17, 0.0  ;;  %v1274_v44 = vmul.f32 %v2085_v29, %v1235_v39  ;;  %v1233_v2 = vadd.f32 %v1166_v36, %v829_v0  ;;  %v840_v19 = vadd.f32 %v1744_v42, %v2044_v6 }
 0x122   : > { %v1169_v45 = vpop.f32.mrf.mxu0  ;;  %v1308_v7 = vadd.f32 %v2090_v34, %v1269_v41  ;;  %v831_v46 = vpop.f32.mrf.mxu1 }
 0x123   : > { %1374 = vst [vmem:[%s2099_s14 + $0x98] sm:$0xff] %v1342_v43  ;;  %v1313_v4 = vadd.f32 %v2090_v34, %v1274_v44  ;;  %v1272_v47 = vmul.f32 %v2085_v29, %v1233_v2  ;;  %v1236_v48 = vadd.f32 %v1780_v40, %v840_v19  ;;  %v832_v49 = vadd.f32 %v831_v46, %v2048_v8 }
 0x124   : > { %v1783_v50 = vpop.f32.mrf.mxu0  ;;  %v1340_v51 = vmax.f32 %v1308_v7, 0.0  ;;  %v1747_v21 = vpop.f32.mrf.mxu1 }
 0x125   : > { %v1345_v9 = vmax.f32 %v1313_v4, 0.0  ;;  %v1311_v6 = vadd.f32 %v2090_v34, %v1272_v47  ;;  %v1275_v52 = vmul.f32 %v2085_v29, %v1236_v48  ;;  %v1234_v53 = vadd.f32 %v1169_v45, %v832_v49 }
 0x126   : > { %v1182_v54 = vpop.f32.mrf.mxu0  ;;  %1372 = vst [vmem:[%s2099_s14 + $0x88] sm:$0xff] %v1340_v51  ;;  %v853_v55 = vadd.f32 %v1747_v21, %v2052_v10  ;;  %v844_v23 = vpop.f32.mrf.mxu1 }
 0x127   : > { %1377 = vst [vmem:[%s2099_s14 + $0xb0] sm:$0xff] %v1345_v9  ;;  %v1343_v56 = vmax.f32 %v1311_v6, 0.0  ;;  %v1314_v8 = vadd.f32 %v2090_v34, %v1275_v52  ;;  %v1273_v57 = vmul.f32 %v2085_v29, %v1234_v53  ;;  %v845_v59 = vadd.f32 %v844_v23, %v2056_v12 }
 0x128   : > { %v1784_v61 = vpop.f32.mrf.mxu0  ;;  %v1239_v58 = vadd.f32 %v1783_v50, %v853_v55  ;;  %v1748_v11 = vpop.f32.mrf.mxu1 }
 0x129   : > { %1375 = vst [vmem:[%s2099_s14 + $0xa0] sm:$0xff] %v1343_v56  ;;  %v1346_v63 = vmax.f32 %v1314_v8, 0.0  ;;  %v1312_v25 = vadd.f32 %v2090_v34, %v1273_v57  ;;  %v1237_v26 = vadd.f32 %v1182_v54, %v845_v59  ;;  %v856_v10 = vadd.f32 %v1748_v11, %v2060_v14 }
 0x12a   : > { %v1185_v27 = vpop.f32.mrf.mxu0  ;;  %v1278_v1 = vmul.f32 %v2085_v29, %v1239_v58  ;;  %v847_v13 = vpop.f32.mrf.mxu1 }
 0x12b   : > { %1378 = vst [vmem:[%s2099_s14 + $0xb8] sm:$0xff] %v1346_v63  ;;  %v1344_v60 = vmax.f32 %v1312_v25, 0.0  ;;  %v1276_v28 = vmul.f32 %v2085_v29, %v1237_v26  ;;  %v1240_v12 = vadd.f32 %v1784_v61, %v856_v10  ;;  %v848_v30 = vadd.f32 %v847_v13, %v2064_v16 }
 0x12c   : > { %v1787_v31 = vpop.f32.mrf.mxu0  ;;  %v1317_v32 = vadd.f32 %v2090_v34, %v1278_v1  ;;  %v1751_v15 = vpop.f32.mrf.mxu1 }
 0x12d   : > { %1376 = vst [vmem:[%s2099_s14 + $0xa8] sm:$0xff] %v1344_v60  ;;  %v1315_v14 = vadd.f32 %v2090_v34, %v1276_v28  ;;  %v1279_v33 = vmul.f32 %v2085_v29, %v1240_v12  ;;  %v1238_v62 = vadd.f32 %v1185_v27, %v848_v30  ;;  %v869_v3 = vadd.f32 %v1751_v15, %v2068_v18 }
 0x12e   : > { %v1198_v35 = vpop.f32.mrf.mxu0  ;;  %v1349_v36 = vmax.f32 %v1317_v32, 0.0  ;;  %v860_v37 = vpop.f32.mrf.mxu1 }
 0x12f   : > { %v1347_v38 = vmax.f32 %v1315_v14, 0.0  ;;  %v1318_v16 = vadd.f32 %v2090_v34, %v1279_v33  ;;  %v1277_v5 = vmul.f32 %v2085_v29, %v1238_v62  ;;  %v1243_v17 = vadd.f32 %v1787_v31, %v869_v3 }
 0x130   : > { %1381 = vst [vmem:[%s2099_s14 + $0xd0] sm:$0xff] %v1349_v36  ;;  %v861_v39 = vadd.f32 %v860_v37, %v2072_v20  ;;  %v1752_v0 = vpop.f32.mrf.mxu1  ;;  %v1788_v40 = vpop.f32.mrf.mxu0 }
 0x131   : > { %1379 = vst [vmem:[%s2099_s14 + $0xc0] sm:$0xff] %v1347_v38  ;;  %v1350_v41 = vmax.f32 %v1318_v16, 0.0  ;;  %v1316_v18 = vadd.f32 %v2090_v34, %v1277_v5  ;;  %v1282_v42 = vmul.f32 %v2085_v29, %v1243_v17  ;;  %v872_v43 = vadd.f32 %v1752_v0, %v2076_v22 }
 0x132   : > { %v1241_v44 = vadd.f32 %v1198_v35, %v861_v39  ;;  %v863_v2 = vpop.f32.mrf.mxu1  ;;  %v1201_v4 = vpop.f32.mrf.mxu0 }
 0x133   : > { %1382 = vst [vmem:[%s2099_s14 + $0xd8] sm:$0xff] %v1350_v41  ;;  %v1348_v19 = vmax.f32 %v1316_v18, 0.0  ;;  %v1321_v45 = vadd.f32 %v2090_v34, %v1282_v42  ;;  %v1244_v20 = vadd.f32 %v1788_v40, %v872_v43  ;;  %v864_v7 = vadd.f32 %v863_v2, %v2080_v24 }
 0x134   : > { %v1280_v46 = vmul.f32 %v2085_v29, %v1241_v44 }
 0x135   : > { %1380 = vst [vmem:[%s2099_s14 + $0xc8] sm:$0xff] %v1348_v19  ;;  %v1353_v47 = vmax.f32 %v1321_v45, 0.0  ;;  %v1283_v48 = vmul.f32 %v2085_v29, %v1244_v20  ;;  %v1242_v22 = vadd.f32 %v1201_v4, %v864_v7 }
 0x136   : > { %v1319_v49 = vadd.f32 %v2090_v34, %v1280_v46 }
 0x137   : > { %1385 = vst [vmem:[%s2099_s14 + $0xf0] sm:$0xff] %v1353_v47  ;;  %v1322_v50 = vadd.f32 %v2090_v34, %v1283_v48  ;;  %v1281_v51 = vmul.f32 %v2085_v29, %v1242_v22 }
 0x138   : > { %v1351_v21 = vmax.f32 %v1319_v49, 0.0 }
 0x139   : > { %v1354_v9 = vmax.f32 %v1322_v50, 0.0  ;;  %v1320_v24 = vadd.f32 %v2090_v34, %v1281_v51 }
 0x13a   : > { %1383 = vst [vmem:[%s2099_s14 + $0xe0] sm:$0xff] %v1351_v21 }
 0x13b   : > { %1386 = vst [vmem:[%s2099_s14 + $0xf8] sm:$0xff] %v1354_v9  ;;  %v1352_v6 = vmax.f32 %v1320_v24, 0.0 }
 0x13d   : > { %1384 = vst [vmem:[%s2099_s14 + $0xe8] sm:$0xff] %v1352_v6 }
 0x13e PF: > { %s14_s15 = sadd.s32 1, %s1866_s15  }
 0x13f   : > { %p11_p4 = scmp.ge.s32.totalorder %s14_s15, 4  }
 0x141   :  { %13 = sbr.rel (!%p11_p4) target bundleno = 1 (0x1), region = 70 }

</bundles_post_ra>
